<compile_context>
chip_gen: v6e
topology: v6e:2x2x1
jax: 0.10.0
libtpu: 0.0.40
codegen_flags: <defaults>
</compile_context>

<pallas_src>
import jax
import jax.numpy as jnp
from jax.experimental import pallas as pl
from jax.experimental.pallas import tpu as pltpu

CRITIC_HIDDEN_DIM = 256
_OUT_LANES = 128          # lane-dense output width; q1 in lane 0, q2 in lane 1
_MAX_BATCH_TILE = 512     # rows per grid step (amortizes per-step overhead)


def _round_up(x, m):
    return (x + m - 1) // m * m


def _critic_kernel(sa_ref,
                   w1_ref, b1_ref,
                   w2a_ref, b2a_ref, w2b_ref, b2b_ref,
                   w3a_ref, b3a_ref, w3b_ref, b3b_ref,
                   wha_ref, whb_ref, bh_ref,
                   q_ref):
    """Both Q trunks + fused lane-dense head for one batch tile, all in VMEM."""
    H = CRITIC_HIDDEN_DIM
    bf16 = jnp.bfloat16

    sa = sa_ref[...].astype(bf16)

    # Layer 1 (fused across both trunks): [TB, in] @ [in, 2H] on the MXU.
    h1 = jnp.dot(sa, w1_ref[...], preferred_element_type=jnp.float32) + b1_ref[...]
    h1 = jnp.maximum(h1, 0.0).astype(bf16)      # single cast, then lane-aligned slices
    h1a = h1[:, :H]                              # q1 trunk
    h1b = h1[:, H:]                              # q2 trunk

    # Layers 2 and 3: independent HxH trunks (bf16 in, f32 accumulate).
    h2a = jnp.maximum(
        jnp.dot(h1a, w2a_ref[...], preferred_element_type=jnp.float32) + b2a_ref[...],
        0.0).astype(bf16)
    h2b = jnp.maximum(
        jnp.dot(h1b, w2b_ref[...], preferred_element_type=jnp.float32) + b2b_ref[...],
        0.0).astype(bf16)

    h3a = jnp.maximum(
        jnp.dot(h2a, w3a_ref[...], preferred_element_type=jnp.float32) + b3a_ref[...],
        0.0).astype(bf16)
    h3b = jnp.maximum(
        jnp.dot(h2b, w3b_ref[...], preferred_element_type=jnp.float32) + b3b_ref[...],
        0.0).astype(bf16)

    # Fused lane-dense head: q1 -> lane 0, q2 -> lane 1 of one [TB, 128] f32 tile.
    q = (jnp.dot(h3a, wha_ref[...], preferred_element_type=jnp.float32)
         + jnp.dot(h3b, whb_ref[...], preferred_element_type=jnp.float32)
         + bh_ref[...])
    q_ref[...] = q.astype(q_ref.dtype)           # one unmasked lane-dense store


def critic_forward(state, action, params):
    """state: [B, state_dim] f32, action: [B, action_dim] f32.
    params: dict of f32 (w, b) with w stored as [in, out].  Returns (q1, q2)."""
    B = state.shape[0]
    H = CRITIC_HIDDEN_DIM
    sa = jnp.concatenate([state, action], axis=-1).astype(jnp.float32)
    in_dim = sa.shape[-1]

    # Batch tiling: single tile for small batches, up to 512-row tiles otherwise.
    if B <= _MAX_BATCH_TILE:
        TB = _round_up(B, 8)
    else:
        TB = _MAX_BATCH_TILE
    B_pad = _round_up(B, TB)
    if B_pad != B:
        sa = jnp.pad(sa, ((0, B_pad - B), (0, 0)))

    bf16 = jnp.bfloat16

    # Fused first layer (shared input).
    w1 = jnp.concatenate([params["q1_w1"], params["q2_w1"]], axis=1).astype(bf16)
    b1 = jnp.concatenate([params["q1_b1"], params["q2_b1"]], axis=1)

    w2a = params["q1_w2"].astype(bf16); b2a = params["q1_b2"]
    w2b = params["q2_w2"].astype(bf16); b2b = params["q2_b2"]
    w3a = params["q1_w3"].astype(bf16); b3a = params["q1_b3"]
    w3b = params["q2_w3"].astype(bf16); b3b = params["q2_b3"]

    # Lane-dense fused head: pad the two [H, 1] head weights into [H, 128]
    # columns 0 and 1 so the kernel emits a single lane-dense output tile.
    wha = jnp.zeros((H, _OUT_LANES), bf16).at[:, 0].set(params["q1_w4"][:, 0].astype(bf16))
    whb = jnp.zeros((H, _OUT_LANES), bf16).at[:, 1].set(params["q2_w4"][:, 0].astype(bf16))
    bh = jnp.zeros((1, _OUT_LANES), jnp.float32)
    bh = bh.at[0, 0].set(params["q1_b4"][0, 0]).at[0, 1].set(params["q2_b4"][0, 0])

    args = (sa, w1, b1, w2a, b2a, w2b, b2b, w3a, b3a, w3b, b3b, wha, whb, bh)

    def const_spec(a):
        # Full-array block, same block index every grid step -> DMA'd once,
        # VMEM-resident across all batch tiles.
        return pl.BlockSpec(a.shape, lambda i: (0, 0))

    grid = (B_pad // TB,)

    flops = 2 * B_pad * (in_dim * 2 * H + 2 * 2 * H * H + 2 * H * _OUT_LANES)
    bytes_accessed = (sum(int(a.size) * a.dtype.itemsize for a in args)
                      + B_pad * _OUT_LANES * 4)

    out = pl.pallas_call(
        _critic_kernel,
        out_shape=jax.ShapeDtypeStruct((B_pad, _OUT_LANES), jnp.float32),
        grid=grid,
        in_specs=[pl.BlockSpec((TB, in_dim), lambda i: (i, 0))]
                 + [const_spec(a) for a in args[1:]],
        out_specs=pl.BlockSpec((TB, _OUT_LANES), lambda i: (i, 0)),
        compiler_params=pltpu.CompilerParams(
            dimension_semantics=("parallel",)),
        cost_estimate=pl.CostEstimate(
            flops=flops, transcendentals=0, bytes_accessed=bytes_accessed),
    )(*args)

    q1 = out[:B, 0:1]
    q2 = out[:B, 1:2]
    return q1, q2


def init_critic_params(key, state_dim, action_dim, hidden_dim=CRITIC_HIDDEN_DIM):
    """Deterministic synthetic init (uniform, PyTorch-Linear-like fan-in bound).
    Weights stored already transposed to [in, out]."""
    def linear(k, fan_in, fan_out):
        kw, kb = jax.random.split(k)
        bound = 1.0 / jnp.sqrt(jnp.float32(fan_in))
        w = jax.random.uniform(kw, (fan_in, fan_out), jnp.float32, -bound, bound)
        b = jax.random.uniform(kb, (1, fan_out), jnp.float32, -bound, bound)
        return w, b

    in_dim = state_dim + action_dim
    dims = [(in_dim, hidden_dim), (hidden_dim, hidden_dim),
            (hidden_dim, hidden_dim), (hidden_dim, 1)]
    keys = jax.random.split(key, 8)
    p = {}
    for net, base in (("q1", 0), ("q2", 4)):
        for li, (fi, fo) in enumerate(dims, start=1):
            w, b = linear(keys[base + li - 1], fi, fo)
            p[f"{net}_w{li}"] = w
            p[f"{net}_b{li}"] = b
    return p


def critic_forward_ref(state, action, params):
    """Pure-JAX reference using the same bf16-input / f32-accumulate path."""
    sa = jnp.concatenate([state, action], axis=-1).astype(jnp.float32)

    def mlp(x, net):
        h = x
        for li in range(1, 4):
            w = params[f"{net}_w{li}"].astype(jnp.bfloat16)
            b = params[f"{net}_b{li}"]
            h = jnp.maximum(
                jnp.dot(h.astype(jnp.bfloat16), w,
                        preferred_element_type=jnp.float32) + b, 0.0)
        w = params[f"{net}_w4"].astype(jnp.bfloat16)
        b = params[f"{net}_b4"]
        return jnp.dot(h.astype(jnp.bfloat16), w,
                       preferred_element_type=jnp.float32) + b

    return mlp(sa, "q1"), mlp(sa, "q2")


if __name__ == "__main__":
    key = jax.random.PRNGKey(0)
    k_s, k_a, k_p = jax.random.split(key, 3)

    B, STATE_DIM, ACTION_DIM = 8, 16, 4
    state = jax.random.normal(k_s, (B, STATE_DIM), jnp.float32)
    action = jax.random.normal(k_a, (B, ACTION_DIM), jnp.float32)
    params = init_critic_params(k_p, STATE_DIM, ACTION_DIM)

    q1, q2 = critic_forward(state, action, params)
    jax.block_until_ready((q1, q2))

    q1_ref, q2_ref = critic_forward_ref(state, action, params)
    assert q1.shape == (B, 1) and q2.shape == (B, 1)
    # bf16 weights/activations -> looser tolerance than pure-f32.
    assert jnp.allclose(q1, q1_ref, atol=1e-2, rtol=1e-2)
    assert jnp.allclose(q2, q2_ref, atol=1e-2, rtol=1e-2)

    print("KERNEL_OK")
</pallas_src>

<mosaic_0001>
module attributes {stable_mosaic.version = 11 : i64} {
  func.func @_critic_kernel(%arg0: i32, %arg1: memref<8x20xf32, #tpu.memory_space<vmem>>, %arg2: memref<20x512xbf16, #tpu.memory_space<vmem>>, %arg3: memref<1x512xf32, #tpu.memory_space<vmem>>, %arg4: memref<256x256xbf16, #tpu.memory_space<vmem>>, %arg5: memref<1x256xf32, #tpu.memory_space<vmem>>, %arg6: memref<256x256xbf16, #tpu.memory_space<vmem>>, %arg7: memref<1x256xf32, #tpu.memory_space<vmem>>, %arg8: memref<256x256xbf16, #tpu.memory_space<vmem>>, %arg9: memref<1x256xf32, #tpu.memory_space<vmem>>, %arg10: memref<256x256xbf16, #tpu.memory_space<vmem>>, %arg11: memref<1x256xf32, #tpu.memory_space<vmem>>, %arg12: memref<256x128xbf16, #tpu.memory_space<vmem>>, %arg13: memref<256x128xbf16, #tpu.memory_space<vmem>>, %arg14: memref<1x128xf32, #tpu.memory_space<vmem>>, %arg15: memref<8x128xf32, #tpu.memory_space<vmem>>) attributes {dimension_semantics = [#tpu.dimension_semantics<parallel>], iteration_bounds = array<i64: 1>, scalar_prefetch = 0 : i64, scratch_operands = 0 : i64, tpu.core_type = #tpu.core_type<tc>, window_params = [{transform_indices = @transform_0, window_bounds = array<i64: 8, 20>}, {pipeline_mode = #tpu.pipeline_mode<synchronous>, transform_indices = @transform_1, window_bounds = array<i64: 20, 512>}, {pipeline_mode = #tpu.pipeline_mode<synchronous>, transform_indices = @transform_2, window_bounds = array<i64: 1, 512>}, {pipeline_mode = #tpu.pipeline_mode<synchronous>, transform_indices = @transform_3, window_bounds = array<i64: 256, 256>}, {pipeline_mode = #tpu.pipeline_mode<synchronous>, transform_indices = @transform_4, window_bounds = array<i64: 1, 256>}, {pipeline_mode = #tpu.pipeline_mode<synchronous>, transform_indices = @transform_5, window_bounds = array<i64: 256, 256>}, {pipeline_mode = #tpu.pipeline_mode<synchronous>, transform_indices = @transform_6, window_bounds = array<i64: 1, 256>}, {pipeline_mode = #tpu.pipeline_mode<synchronous>, transform_indices = @transform_7, window_bounds = array<i64: 256, 256>}, {pipeline_mode = #tpu.pipeline_mode<synchronous>, transform_indices = @transform_8, window_bounds = array<i64: 1, 256>}, {pipeline_mode = #tpu.pipeline_mode<synchronous>, transform_indices = @transform_9, window_bounds = array<i64: 256, 256>}, {pipeline_mode = #tpu.pipeline_mode<synchronous>, transform_indices = @transform_10, window_bounds = array<i64: 1, 256>}, {pipeline_mode = #tpu.pipeline_mode<synchronous>, transform_indices = @transform_11, window_bounds = array<i64: 256, 128>}, {pipeline_mode = #tpu.pipeline_mode<synchronous>, transform_indices = @transform_12, window_bounds = array<i64: 256, 128>}, {pipeline_mode = #tpu.pipeline_mode<synchronous>, transform_indices = @transform_13, window_bounds = array<i64: 1, 128>}, {transform_indices = @transform_14, window_bounds = array<i64: 8, 128>}]} {
    %c0 = arith.constant 0 : index
    %c0_0 = arith.constant 0 : index
    %0 = vector.load %arg1[%c0, %c0_0] : memref<8x20xf32, #tpu.memory_space<vmem>>, vector<8x20xf32>
    %1 = arith.truncf %0 : vector<8x20xf32> to vector<8x20xbf16>
    %c0_1 = arith.constant 0 : index
    %c0_2 = arith.constant 0 : index
    %2 = vector.load %arg2[%c0_1, %c0_2] : memref<20x512xbf16, #tpu.memory_space<vmem>>, vector<20x512xbf16>
    %cst = arith.constant dense<0.000000e+00> : vector<8x512xf32>
    %3 = tpu.matmul %1, %2, %cst {dimension_numbers = #tpu.dot_dimension_numbers<[1], [0], [0], [1], [0, 0, 1, 1], [], []>} : vector<8x20xbf16>, vector<20x512xbf16>, vector<8x512xf32> -> vector<8x512xf32>
    %c0_3 = arith.constant 0 : index
    %c0_4 = arith.constant 0 : index
    %4 = vector.load %arg3[%c0_3, %c0_4] : memref<1x512xf32, #tpu.memory_space<vmem>>, vector<1x512xf32>
    %5 = vector.broadcast %4 : vector<1x512xf32> to vector<8x512xf32>
    %6 = arith.addf %3, %5 : vector<8x512xf32>
    %cst_5 = arith.constant 0.000000e+00 : f32
    %7 = vector.broadcast %cst_5 : f32 to vector<8x512xf32>
    %8 = arith.maximumf %6, %7 : vector<8x512xf32>
    %9 = arith.truncf %8 : vector<8x512xf32> to vector<8x512xbf16>
    %10 = vector.extract_strided_slice %9 {offsets = [0, 0], sizes = [8, 256], strides = [1, 1]} : vector<8x512xbf16> to vector<8x256xbf16>
    %11 = vector.extract_strided_slice %9 {offsets = [0, 256], sizes = [8, 256], strides = [1, 1]} : vector<8x512xbf16> to vector<8x256xbf16>
    %c0_6 = arith.constant 0 : index
    %c0_7 = arith.constant 0 : index
    %12 = vector.load %arg4[%c0_6, %c0_7] : memref<256x256xbf16, #tpu.memory_space<vmem>>, vector<256x256xbf16>
    %cst_8 = arith.constant dense<0.000000e+00> : vector<8x256xf32>
    %13 = tpu.matmul %10, %12, %cst_8 {dimension_numbers = #tpu.dot_dimension_numbers<[1], [0], [0], [1], [0, 0, 1, 1], [], []>} : vector<8x256xbf16>, vector<256x256xbf16>, vector<8x256xf32> -> vector<8x256xf32>
    %c0_9 = arith.constant 0 : index
    %c0_10 = arith.constant 0 : index
    %14 = vector.load %arg5[%c0_9, %c0_10] : memref<1x256xf32, #tpu.memory_space<vmem>>, vector<1x256xf32>
    %15 = vector.broadcast %14 : vector<1x256xf32> to vector<8x256xf32>
    %16 = arith.addf %13, %15 : vector<8x256xf32>
    %cst_11 = arith.constant 0.000000e+00 : f32
    %17 = vector.broadcast %cst_11 : f32 to vector<8x256xf32>
    %18 = arith.maximumf %16, %17 : vector<8x256xf32>
    %19 = arith.truncf %18 : vector<8x256xf32> to vector<8x256xbf16>
    %c0_12 = arith.constant 0 : index
    %c0_13 = arith.constant 0 : index
    %20 = vector.load %arg6[%c0_12, %c0_13] : memref<256x256xbf16, #tpu.memory_space<vmem>>, vector<256x256xbf16>
    %cst_14 = arith.constant dense<0.000000e+00> : vector<8x256xf32>
    %21 = tpu.matmul %11, %20, %cst_14 {dimension_numbers = #tpu.dot_dimension_numbers<[1], [0], [0], [1], [0, 0, 1, 1], [], []>} : vector<8x256xbf16>, vector<256x256xbf16>, vector<8x256xf32> -> vector<8x256xf32>
    %c0_15 = arith.constant 0 : index
    %c0_16 = arith.constant 0 : index
    %22 = vector.load %arg7[%c0_15, %c0_16] : memref<1x256xf32, #tpu.memory_space<vmem>>, vector<1x256xf32>
    %23 = vector.broadcast %22 : vector<1x256xf32> to vector<8x256xf32>
    %24 = arith.addf %21, %23 : vector<8x256xf32>
    %cst_17 = arith.constant 0.000000e+00 : f32
    %25 = vector.broadcast %cst_17 : f32 to vector<8x256xf32>
    %26 = arith.maximumf %24, %25 : vector<8x256xf32>
    %27 = arith.truncf %26 : vector<8x256xf32> to vector<8x256xbf16>
    %c0_18 = arith.constant 0 : index
    %c0_19 = arith.constant 0 : index
    %28 = vector.load %arg8[%c0_18, %c0_19] : memref<256x256xbf16, #tpu.memory_space<vmem>>, vector<256x256xbf16>
    %cst_20 = arith.constant dense<0.000000e+00> : vector<8x256xf32>
    %29 = tpu.matmul %19, %28, %cst_20 {dimension_numbers = #tpu.dot_dimension_numbers<[1], [0], [0], [1], [0, 0, 1, 1], [], []>} : vector<8x256xbf16>, vector<256x256xbf16>, vector<8x256xf32> -> vector<8x256xf32>
    %c0_21 = arith.constant 0 : index
    %c0_22 = arith.constant 0 : index
    %30 = vector.load %arg9[%c0_21, %c0_22] : memref<1x256xf32, #tpu.memory_space<vmem>>, vector<1x256xf32>
    %31 = vector.broadcast %30 : vector<1x256xf32> to vector<8x256xf32>
    %32 = arith.addf %29, %31 : vector<8x256xf32>
    %cst_23 = arith.constant 0.000000e+00 : f32
    %33 = vector.broadcast %cst_23 : f32 to vector<8x256xf32>
    %34 = arith.maximumf %32, %33 : vector<8x256xf32>
    %35 = arith.truncf %34 : vector<8x256xf32> to vector<8x256xbf16>
    %c0_24 = arith.constant 0 : index
    %c0_25 = arith.constant 0 : index
    %36 = vector.load %arg10[%c0_24, %c0_25] : memref<256x256xbf16, #tpu.memory_space<vmem>>, vector<256x256xbf16>
    %cst_26 = arith.constant dense<0.000000e+00> : vector<8x256xf32>
    %37 = tpu.matmul %27, %36, %cst_26 {dimension_numbers = #tpu.dot_dimension_numbers<[1], [0], [0], [1], [0, 0, 1, 1], [], []>} : vector<8x256xbf16>, vector<256x256xbf16>, vector<8x256xf32> -> vector<8x256xf32>
    %c0_27 = arith.constant 0 : index
    %c0_28 = arith.constant 0 : index
    %38 = vector.load %arg11[%c0_27, %c0_28] : memref<1x256xf32, #tpu.memory_space<vmem>>, vector<1x256xf32>
    %39 = vector.broadcast %38 : vector<1x256xf32> to vector<8x256xf32>
    %40 = arith.addf %37, %39 : vector<8x256xf32>
    %cst_29 = arith.constant 0.000000e+00 : f32
    %41 = vector.broadcast %cst_29 : f32 to vector<8x256xf32>
    %42 = arith.maximumf %40, %41 : vector<8x256xf32>
    %43 = arith.truncf %42 : vector<8x256xf32> to vector<8x256xbf16>
    %c0_30 = arith.constant 0 : index
    %c0_31 = arith.constant 0 : index
    %44 = vector.load %arg12[%c0_30, %c0_31] : memref<256x128xbf16, #tpu.memory_space<vmem>>, vector<256x128xbf16>
    %cst_32 = arith.constant dense<0.000000e+00> : vector<8x128xf32>
    %45 = tpu.matmul %35, %44, %cst_32 {dimension_numbers = #tpu.dot_dimension_numbers<[1], [0], [0], [1], [0, 0, 1, 1], [], []>} : vector<8x256xbf16>, vector<256x128xbf16>, vector<8x128xf32> -> vector<8x128xf32>
    %c0_33 = arith.constant 0 : index
    %c0_34 = arith.constant 0 : index
    %46 = vector.load %arg13[%c0_33, %c0_34] : memref<256x128xbf16, #tpu.memory_space<vmem>>, vector<256x128xbf16>
    %cst_35 = arith.constant dense<0.000000e+00> : vector<8x128xf32>
    %47 = tpu.matmul %43, %46, %cst_35 {dimension_numbers = #tpu.dot_dimension_numbers<[1], [0], [0], [1], [0, 0, 1, 1], [], []>} : vector<8x256xbf16>, vector<256x128xbf16>, vector<8x128xf32> -> vector<8x128xf32>
    %48 = arith.addf %45, %47 : vector<8x128xf32>
    %c0_36 = arith.constant 0 : index
    %c0_37 = arith.constant 0 : index
    %49 = vector.load %arg14[%c0_36, %c0_37] : memref<1x128xf32, #tpu.memory_space<vmem>>, vector<1x128xf32>
    %50 = vector.broadcast %49 : vector<1x128xf32> to vector<8x128xf32>
    %51 = arith.addf %48, %50 : vector<8x128xf32>
    %c0_38 = arith.constant 0 : index
    %c0_39 = arith.constant 0 : index
    %52 = vector.load %arg15[%c0_38, %c0_39] : memref<8x128xf32, #tpu.memory_space<vmem>>, vector<8x128xf32>
    tpu.vector_store %arg15[%c0_38, %c0_39], %51 {strides = array<i32>} : memref<8x128xf32, #tpu.memory_space<vmem>>, vector<8x128xf32>,
    return
  }
  func.func @transform_0(%arg0: i32) -> (i32, i32) {
    %c0_i32 = arith.constant 0 : i32
    %c0_i32_0 = arith.constant 0 : i32
    return %arg0, %c0_i32 : i32, i32
  }
  func.func @transform_1(%arg0: i32) -> (i32, i32) {
    %c0_i32 = arith.constant 0 : i32
    %c0_i32_0 = arith.constant 0 : i32
    %c0_i32_1 = arith.constant 0 : i32
    return %c0_i32, %c0_i32_0 : i32, i32
  }
  func.func @transform_2(%arg0: i32) -> (i32, i32) {
    %c0_i32 = arith.constant 0 : i32
    %c0_i32_0 = arith.constant 0 : i32
    %c0_i32_1 = arith.constant 0 : i32
    return %c0_i32, %c0_i32_0 : i32, i32
  }
  func.func @transform_3(%arg0: i32) -> (i32, i32) {
    %c0_i32 = arith.constant 0 : i32
    %c0_i32_0 = arith.constant 0 : i32
    %c0_i32_1 = arith.constant 0 : i32
    return %c0_i32, %c0_i32_0 : i32, i32
  }
  func.func @transform_4(%arg0: i32) -> (i32, i32) {
    %c0_i32 = arith.constant 0 : i32
    %c0_i32_0 = arith.constant 0 : i32
    %c0_i32_1 = arith.constant 0 : i32
    return %c0_i32, %c0_i32_0 : i32, i32
  }
  func.func @transform_5(%arg0: i32) -> (i32, i32) {
    %c0_i32 = arith.constant 0 : i32
    %c0_i32_0 = arith.constant 0 : i32
    %c0_i32_1 = arith.constant 0 : i32
    return %c0_i32, %c0_i32_0 : i32, i32
  }
  func.func @transform_6(%arg0: i32) -> (i32, i32) {
    %c0_i32 = arith.constant 0 : i32
    %c0_i32_0 = arith.constant 0 : i32
    %c0_i32_1 = arith.constant 0 : i32
    return %c0_i32, %c0_i32_0 : i32, i32
  }
  func.func @transform_7(%arg0: i32) -> (i32, i32) {
    %c0_i32 = arith.constant 0 : i32
    %c0_i32_0 = arith.constant 0 : i32
    %c0_i32_1 = arith.constant 0 : i32
    return %c0_i32, %c0_i32_0 : i32, i32
  }
  func.func @transform_8(%arg0: i32) -> (i32, i32) {
    %c0_i32 = arith.constant 0 : i32
    %c0_i32_0 = arith.constant 0 : i32
    %c0_i32_1 = arith.constant 0 : i32
    return %c0_i32, %c0_i32_0 : i32, i32
  }
  func.func @transform_9(%arg0: i32) -> (i32, i32) {
    %c0_i32 = arith.constant 0 : i32
    %c0_i32_0 = arith.constant 0 : i32
    %c0_i32_1 = arith.constant 0 : i32
    return %c0_i32, %c0_i32_0 : i32, i32
  }
  func.func @transform_10(%arg0: i32) -> (i32, i32) {
    %c0_i32 = arith.constant 0 : i32
    %c0_i32_0 = arith.constant 0 : i32
    %c0_i32_1 = arith.constant 0 : i32
    return %c0_i32, %c0_i32_0 : i32, i32
  }
  func.func @transform_11(%arg0: i32) -> (i32, i32) {
    %c0_i32 = arith.constant 0 : i32
    %c0_i32_0 = arith.constant 0 : i32
    %c0_i32_1 = arith.constant 0 : i32
    return %c0_i32, %c0_i32_0 : i32, i32
  }
  func.func @transform_12(%arg0: i32) -> (i32, i32) {
    %c0_i32 = arith.constant 0 : i32
    %c0_i32_0 = arith.constant 0 : i32
    %c0_i32_1 = arith.constant 0 : i32
    return %c0_i32, %c0_i32_0 : i32, i32
  }
  func.func @transform_13(%arg0: i32) -> (i32, i32) {
    %c0_i32 = arith.constant 0 : i32
    %c0_i32_0 = arith.constant 0 : i32
    %c0_i32_1 = arith.constant 0 : i32
    return %c0_i32, %c0_i32_0 : i32, i32
  }
  func.func @transform_14(%arg0: i32) -> (i32, i32) {
    %c0_i32 = arith.constant 0 : i32
    %c0_i32_0 = arith.constant 0 : i32
    return %arg0, %c0_i32 : i32, i32
  }
}

</mosaic_0001>

<bundles_post_ra>
// kernel: tpu_custom_call.1
= control target key start
LH: loop header
LB: loop body
LE: loop exit
PB: predicated region body
PF: predicated region fallthrough
CT: control target
= control target key end

     0   :  { %19 = vsyncpa [#allocation3], 0  ;;  %s2543_s0 = inlined_call_operand.hbm [shape: f32[8,20], index: 0, kind: input, shape index: {}]   ;;  %s2544_s1 = inlined_call_operand.hbm [shape: bf16[20,512], index: 1, kind: input, shape index: {}]   ;;  %s2545_s2 = inlined_call_operand.hbm [shape: f32[1,512], index: 2, kind: input, shape index: {}]   ;;  %s2546_s3 = inlined_call_operand.hbm [shape: bf16[256,256], index: 3, kind: input, shape index: {}]   ;;  %s2547_s4 = inlined_call_operand.vmem [shape: f32[1,256], index: 4, kind: input, shape index: {}]   ;;  %s2548_s5 = inlined_call_operand.hbm [shape: bf16[256,256], index: 5, kind: input, shape index: {}]   ;;  %s2549_s6 = inlined_call_operand.vmem [shape: f32[1,256], index: 6, kind: input, shape index: {}]   ;;  %s2550_s7 = inlined_call_operand.hbm [shape: bf16[256,256], index: 7, kind: input, shape index: {}]   ;;  %s2551_s8 = inlined_call_operand.vmem [shape: f32[1,256], index: 8, kind: input, shape index: {}]   ;;  %s2552_s9 = inlined_call_operand.hbm [shape: bf16[256,256], index: 9, kind: input, shape index: {}]   ;;  %s2553_s10 = inlined_call_operand.vmem [shape: f32[1,256], index: 10, kind: input, shape index: {}]   ;;  %s2554_s11 = inlined_call_operand.hbm [shape: bf16[256,128], index: 11, kind: input, shape index: {}]   ;;  %s2555_s12 = inlined_call_operand.hbm [shape: bf16[256,128], index: 12, kind: input, shape index: {}]   ;;  %s2556_s13 = inlined_call_operand.vmem [shape: f32[1,128], index: 13, kind: input, shape index: {}]   ;;  %s2557_s14 = inlined_call_operand.hbm [shape: f32[8,128], index: 14, kind: output, shape index: {}]  }
   0x1   :  { %20 = vsyncpa [#allocation6], 0 }
   0x2   :  { %21 = vsyncpa [#allocation9], 0 }
   0x3   :  { %22 = vsyncpa [#allocation12], 0 }
   0x4   :  { %23 = vsyncpa [#allocation15], 0 }
   0x5   :  { %24 = vsyncpa [#allocation4], 0  ;;  %s2374_s29 = smov [#allocation5]  }
   0x6   :  { %s40_s30 = sshll.u32 %s2374_s29, 4  ;;  %s41_s30 = int_to_ptr.vmem [resolvable:$true] %s40_s30 }
   0x7   :  { %s2170_s15 = scalar_lea.vmem %s41_s30, 768  ;;  %p2175_p1 = scmp.lt.s32.totalorder %s41_s30, %s41_s30 }
   0x8   :  { %p2171_p0 = scmp.ne.s32.totalorder %s41_s30, %s2170_s15  ;;  %p2176_p2 = scmp.lt.s32.totalorder %s2170_s15, %s2170_s15 }
   0xa   :  { %p2177_p3 = por %p2176_p2, %p2175_p1 }
   0xc   :  { %p2178_p4 = pnand %p2177_p3, %p2171_p0 }
   0xe   :  { %2181 = shalt.err (!%p2178_p4)
}
   0xf   :  { %s2375_s16 = smov 256   ;;  %s2376_s17 = smov 16  }
  0x10   :  { %46 = dma.hbm_to_vmem [thread:$0]  %s2544_s1, 768, %s41_s30, [#allocation6], %s2375_s16, %s2375_s16, %s2376_s17  }
  0x11   :  { %s2377_s20 = smov [#allocation8]  }
  0x12   :  { %s62_s21 = sshll.u32 %s2377_s20, 4  ;;  %s63_s21 = int_to_ptr.vmem [resolvable:$true] %s62_s21 }
  0x13   :  { %s2190_s22 = scalar_lea.vmem %s63_s21, 4096  ;;  %p2195_p6 = scmp.lt.s32.totalorder %s63_s21, %s63_s21 }
  0x14   :  { %p2191_p5 = scmp.ne.s32.totalorder %s63_s21, %s2190_s22  ;;  %p2196_p7 = scmp.lt.s32.totalorder %s2190_s22, %s2190_s22 }
  0x16   :  { %p2197_p8 = por %p2196_p7, %p2195_p6 }
  0x18   :  { %p2198_p9 = pnand %p2197_p8, %p2191_p5 }
  0x1a   :  { %2201 = shalt.err (!%p2198_p9)
}
  0x1b   :  { %s2378_s23 = smov 128   ;;  %s2379_s24 = smov 8  }
  0x1c   :  { %68 = dma.hbm_to_vmem [thread:$0]  %s2546_s3, 4096, %s63_s21, [#allocation9], %s2378_s23, %s2378_s23, %s2379_s24  }
  0x1d   :  { %s2380_s1 = smov [#allocation11]   ;;  %s2381_s28 = smov [#allocation14]  }
  0x1e   :  { %s90_s27 = sshll.u32 %s2380_s1, 4  ;;  %s118_s29 = sshll.u32 %s2381_s28, 4  ;;  %s91_s27 = int_to_ptr.vmem [resolvable:$true] %s90_s27  ;;  %s119_s29 = int_to_ptr.vmem [resolvable:$true] %s118_s29 }
  0x1f   :  { %s2210_s30 = scalar_lea.vmem %s91_s27, 4096  ;;  %p2215_p11 = scmp.lt.s32.totalorder %s91_s27, %s91_s27 }
  0x20   :  { %p2211_p10 = scmp.ne.s32.totalorder %s91_s27, %s2210_s30  ;;  %p2216_p12 = scmp.lt.s32.totalorder %s2210_s30, %s2210_s30 }
  0x22   :  { %p2217_p13 = por %p2216_p12, %p2215_p11 }
  0x24   :  { %p2218_p0 = pnand %p2217_p13, %p2211_p10 }
  0x26   :  { %2221 = shalt.err (!%p2218_p0)
}
  0x27   :  { %96 = dma.hbm_to_vmem [thread:$0]  %s2550_s7, 4096, %s91_s27, [#allocation12], %s2378_s23, %s2378_s23, %s2379_s24  }
  0x28   :  { %s2230_s3 = scalar_lea.vmem %s119_s29, 2048  ;;  %p2235_p2 = scmp.lt.s32.totalorder %s119_s29, %s119_s29 }
  0x29   :  { %p2231_p1 = scmp.ne.s32.totalorder %s119_s29, %s2230_s3  ;;  %p2236_p3 = scmp.lt.s32.totalorder %s2230_s3, %s2230_s3 }
  0x2b   :  { %p2237_p4 = por %p2236_p3, %p2235_p2 }
  0x2d   :  { %p2238_p5 = pnand %p2237_p4, %p2231_p1 }
  0x2f   :  { %2241 = shalt.err (!%p2238_p5)
}
  0x30   :  { %s2382_s17 = smov 64   ;;  %s2383_s18 = smov 4  }
  0x31   :  { %124 = dma.hbm_to_vmem [thread:$0]  %s2554_s11, 2048, %s119_s29, [#allocation15], %s2382_s17, %s2382_s17, %s2383_s18  }
  0x32   :  { %s2384_s21 = smov [#allocation2]   ;;  %s2385_s25 = smov [#allocation7]  }
  0x33   :  { %s31_s22 = sshll.u32 %s2384_s21, 4  ;;  %s53_s7 = sshll.u32 %s2385_s25, 4  ;;  %s32_s22 = int_to_ptr.vmem [resolvable:$true] %s31_s22  ;;  %s54_s7 = int_to_ptr.vmem [resolvable:$true] %s53_s7 }
  0x34   :  { %s2250_s26 = scalar_lea.vmem %s32_s22, 128  ;;  %p2255_p7 = scmp.lt.s32.totalorder %s32_s22, %s32_s22 }
  0x35   :  { %p2251_p6 = scmp.ne.s32.totalorder %s32_s22, %s2250_s26  ;;  %p2256_p8 = scmp.lt.s32.totalorder %s2250_s26, %s2250_s26 }
  0x37   :  { %p2257_p9 = por %p2256_p8, %p2255_p7 }
  0x39   :  { %p2258_p10 = pnand %p2257_p9, %p2251_p6 }
  0x3b   :  { %2261 = shalt.err (!%p2258_p10)
}
  0x3c   :  { %34 = dma.hbm_to_vmem [thread:$0]  %s2543_s0, 128, %s32_s22, [#allocation3]  }
  0x3d   :  { %s2270_s28 = scalar_lea.vmem %s54_s7, 64  ;;  %p2275_p12 = scmp.lt.s32.totalorder %s54_s7, %s54_s7 }
  0x3e   :  { %p2271_p11 = scmp.ne.s32.totalorder %s54_s7, %s2270_s28  ;;  %p2276_p13 = scmp.lt.s32.totalorder %s2270_s28, %s2270_s28 }
  0x40   :  { %p2277_p0 = por %p2276_p13, %p2275_p12 }
  0x42   :  { %p2278_p1 = pnand %p2277_p0, %p2271_p11 }
  0x44   :  { %2281 = shalt.err (!%p2278_p1)
}
  0x45   :  { %56 = dma.hbm_to_vmem [thread:$0]  %s2545_s2, 64, %s54_s7, [#allocation6]  }
  0x46   :  { %s2386_s30 = smov [#allocation10]   ;;  %s2387_s16 = smov [#allocation13]  }
  0x47   :  { %s76_s15 = sshll.u32 %s2386_s30, 4  ;;  %s104_s3 = sshll.u32 %s2387_s16, 4  ;;  %s77_s15 = int_to_ptr.vmem [resolvable:$true] %s76_s15  ;;  %s105_s3 = int_to_ptr.vmem [resolvable:$true] %s104_s3 }
  0x48   :  { %s2290_s19 = scalar_lea.vmem %s77_s15, 4096  ;;  %p2295_p3 = scmp.lt.s32.totalorder %s77_s15, %s77_s15 }
  0x49   :  { %p2291_p2 = scmp.ne.s32.totalorder %s77_s15, %s2290_s19  ;;  %p2296_p4 = scmp.lt.s32.totalorder %s2290_s19, %s2290_s19 }
  0x4b   :  { %p2297_p5 = por %p2296_p4, %p2295_p3 }
  0x4d   :  { %p2298_p6 = pnand %p2297_p5, %p2291_p2 }
  0x4f   :  { %2301 = shalt.err (!%p2298_p6)
}
  0x50   :  { %82 = dma.hbm_to_vmem [thread:$0]  %s2548_s5, 4096, %s77_s15, [#allocation9], %s2378_s23, %s2378_s23, %s2379_s24  }
  0x51   :  { %s2310_s2 = scalar_lea.vmem %s105_s3, 4096  ;;  %p2315_p8 = scmp.lt.s32.totalorder %s105_s3, %s105_s3 }
  0x52   :  { %p2311_p7 = scmp.ne.s32.totalorder %s105_s3, %s2310_s2  ;;  %p2316_p9 = scmp.lt.s32.totalorder %s2310_s2, %s2310_s2 }
  0x54   :  { %p2317_p10 = por %p2316_p9, %p2315_p8 }
  0x56   :  { %p2318_p11 = pnand %p2317_p10, %p2311_p7 }
  0x58   :  { %2321 = shalt.err (!%p2318_p11)
}
  0x59   :  { %110 = dma.hbm_to_vmem [thread:$0]  %s2552_s9, 4096, %s105_s3, [#allocation12], %s2378_s23, %s2378_s23, %s2379_s24  }
  0x5a   :  { %s2388_s25 = smov [#allocation16]  }
  0x5b   :  { %s130_s7 = sshll.u32 %s2388_s25, 4  ;;  %s131_s7 = int_to_ptr.vmem [resolvable:$true] %s130_s7 }
  0x5c   :  { %s2330_s26 = scalar_lea.vmem %s131_s7, 2048  ;;  %p2335_p13 = scmp.lt.s32.totalorder %s131_s7, %s131_s7 }
  0x5d   :  { %p2331_p12 = scmp.ne.s32.totalorder %s131_s7, %s2330_s26  ;;  %p2336_p0 = scmp.lt.s32.totalorder %s2330_s26, %s2330_s26 }
  0x5f   :  { %p2337_p1 = por %p2336_p0, %p2335_p13 }
  0x61   :  { %p2338_p2 = pnand %p2337_p1, %p2331_p12 }
  0x63   :  { %2341 = shalt.err (!%p2338_p2)
}
  0x64   :  { %136 = dma.hbm_to_vmem [thread:$0]  %s2555_s12, 2048, %s131_s7, [#allocation15], %s2382_s17, %s2382_s17, %s2383_s18  }
  0x65   :  { %2362 = dma.done.wait [#allocation3], 128  }
  0x66   :  { %2363 = vsyncadd [#allocation3], 4294967168 }
  0x67   :  { %2364 = dma.done.wait [#allocation6], 832  }
  0x68   :  { %2365 = vsyncadd [#allocation6], 4294966464 }
  0x69   :  { %2366 = dma.done.wait [#allocation9], 8192  }
  0x6a   :  { %2367 = vsyncadd [#allocation9], 4294959104 }
  0x6b   :  { %2368 = dma.done.wait [#allocation12], 8192  }
  0x6c   :  { %2369 = vsyncadd [#allocation12], 4294959104 }
  0x6d   :  { %2370 = dma.done.wait [#allocation15], 4096  }
  0x6e   :  { %2371 = vsyncadd [#allocation15], 4294963200  ;;  %v2389_v0 = vmov 0   ;;  %v173_v1 = vld [vmem:[#allocation5 + $0x20] sm:$0x33]  ;;  %vm231_vm0 = vcmask 1041408  }
  0x6f   :  { %276 = vmatprep.mubr.bf16.mxu0 %v2389_v0  ;;  %317 = vmatprep.mubr.bf16.mxu1 %v2389_v0  ;;  %v174_v2 = vld [vmem:[#allocation5 + $0x28] sm:$0x33]  ;;  %v1699_v3 = vcombine.high %v173_v1, %v173_v1  ;;  %v1698_v5 = vcombine.low %v173_v1, %v173_v1  ;;  %v1932_v7 = vld [vmem:[#allocation5 + $0x4] ss:$16 sps:$4 sm:$0xff]   ;;  %v1936_v11 = vld [vmem:[#allocation5] ss:$16 sps:$4 sm:$0xff]  }
  0x70   :  { %v1701_v4 = vcombine.high %v174_v2, %v174_v2  ;;  %v1700_v6 = vcombine.low %v174_v2, %v174_v2  ;;  %v1934_v8 = vld [vmem:[#allocation5 + $0xc] ss:$16 sps:$4 sm:$0xff]   ;;  %v1937_v12 = vld [vmem:[#allocation5 + $0x8] ss:$16 sps:$4 sm:$0xff]   ;;  %vm227_vm1 = vcmask 162816   ;;  %s2390_s27 = smov [#allocation17]  }
  0x71   :  { %1702 = vmatprep.subr.msk.bf16.mxu0 %vm231_vm0, %v1699_v3  ;;  %v233_v9 = vsel %vm231_vm0, %v1698_v5, 0  ;;  %v167_v13 = vld [vmem:[#allocation2] sm:$0xff]  ;;  %v1940_v14 = vld [vmem:[#allocation8 + $0x74] ss:$8 sps:$4 sm:$0xff]   ;;  %v1938_v17 = vld [vmem:[#allocation8 + $0x70] ss:$8 sps:$4 sm:$0xff]  }
  0x72   :  { %1704 = vmatprep.subr.msk.bf16.mxu1 %vm231_vm0, %v1701_v4  ;;  %v239_v10 = vsel %vm231_vm0, %v1700_v6, 0  ;;  %257 = vmatpush1.bf16.msra.mxu0 %v233_v9  ;;  %v1943_v15 = vld [vmem:[#allocation10 + $0x74] ss:$8 sps:$4 sm:$0xff]   ;;  %v168_v16 = vpack.c.bf16 %v167_v13, %v167_v13  ;;  %v1941_v18 = vld [vmem:[#allocation10 + $0x70] ss:$8 sps:$4 sm:$0xff]   ;;  %s1681_s28 = sshll.u32 %s2390_s27, 4  ;;  %s1682_s28 = int_to_ptr.vmem [resolvable:$true] %s1681_s28 }
  0x73   :  { %298 = vmatpush1.bf16.msra.mxu1 %v239_v10  ;;  %258 = vmatprep.subr.bf16.mxu0 %v1932_v7  ;;  %v1946_v19 = vld [vmem:[#allocation8 + $0x64] ss:$8 sps:$4 sm:$0xff]   ;;  %v1944_v21 = vld [vmem:[#allocation8 + $0x60] ss:$8 sps:$4 sm:$0xff]   ;;  %v1952_v23 = vld [vmem:[#allocation8 + $0x54] ss:$8 sps:$4 sm:$0xff]   ;;  %p2347_p4 = scmp.lt.s32.totalorder %s1682_s28, %s1682_s28 }
  0x74   :  { %299 = vmatprep.subr.bf16.mxu1 %v1934_v8  ;;  %v1949_v20 = vld [vmem:[#allocation10 + $0x64] ss:$8 sps:$4 sm:$0xff]   ;;  %v1947_v22 = vld [vmem:[#allocation10 + $0x60] ss:$8 sps:$4 sm:$0xff]   ;;  %v1955_v24 = vld [vmem:[#allocation10 + $0x54] ss:$8 sps:$4 sm:$0xff]  }
  0x75   :  { %v1950_v25 = vld [vmem:[#allocation8 + $0x50] ss:$8 sps:$4 sm:$0xff]   ;;  %v1958_v27 = vld [vmem:[#allocation8 + $0x44] ss:$8 sps:$4 sm:$0xff]   ;;  %v1956_v29 = vld [vmem:[#allocation8 + $0x40] ss:$8 sps:$4 sm:$0xff]  }
  0x76   :  { %259 = vmatpush1.bf16.msra.mxu0 %v1936_v11  ;;  %v1953_v26 = vld [vmem:[#allocation10 + $0x50] ss:$8 sps:$4 sm:$0xff]   ;;  %v1961_v28 = vld [vmem:[#allocation10 + $0x44] ss:$8 sps:$4 sm:$0xff]   ;;  %v1959_v30 = vld [vmem:[#allocation10 + $0x40] ss:$8 sps:$4 sm:$0xff]  }
  0x77   :  { %300 = vmatpush1.bf16.msra.mxu1 %v1937_v12  ;;  %538 = vmatprep.subr.bf16.mxu0 %v1940_v14  ;;  %v1964_v31 = vld [vmem:[#allocation8 + $0x34] ss:$8 sps:$4 sm:$0xff]   ;;  %v1962_v33 = vld [vmem:[#allocation8 + $0x30] ss:$8 sps:$4 sm:$0xff]   ;;  %v1970_v35 = vld [vmem:[#allocation8 + $0x24] ss:$8 sps:$4 sm:$0xff]  }
  0x78   :  { %787 = vmatprep.subr.bf16.mxu1 %v1943_v15  ;;  %v1967_v32 = vld [vmem:[#allocation10 + $0x34] ss:$8 sps:$4 sm:$0xff]   ;;  %v1965_v34 = vld [vmem:[#allocation10 + $0x30] ss:$8 sps:$4 sm:$0xff]   ;;  %v1973_v36 = vld [vmem:[#allocation10 + $0x24] ss:$8 sps:$4 sm:$0xff]  }
  0x79   :  { %1703 = vmatmul.mubr.msk.bf16.vlgmr.msra.gmra.mxu0 %vm227_vm1, %v168_v16  ;;  %v1968_v37 = vld [vmem:[#allocation8 + $0x20] ss:$8 sps:$4 sm:$0xff]   ;;  %v1976_v39 = vld [vmem:[#allocation8 + $0x14] ss:$8 sps:$4 sm:$0xff]   ;;  %v1974_v41 = vld [vmem:[#allocation8 + $0x10] ss:$8 sps:$4 sm:$0xff]  }
  0x7a   :  { %1705 = vmatmul.mubr.msk.bf16.vlgmr.msra.gmra.mxu1 %vm227_vm1, %v168_v16  ;;  %539 = vmatpush1.bf16.msra.mxu0 %v1938_v17  ;;  %v1971_v38 = vld [vmem:[#allocation10 + $0x20] ss:$8 sps:$4 sm:$0xff]   ;;  %v1979_v40 = vld [vmem:[#allocation10 + $0x14] ss:$8 sps:$4 sm:$0xff]   ;;  %v1977_v42 = vld [vmem:[#allocation10 + $0x10] ss:$8 sps:$4 sm:$0xff]   ;;  %v177_v17 = vlaneseq }
  0x7b   :  { %788 = vmatpush1.bf16.msra.mxu1 %v1941_v18  ;;  %540 = vmatprep.subr.bf16.mxu0 %v1946_v19  ;;  %v1982_v43 = vld [vmem:[#allocation8 + $0x4] ss:$8 sps:$4 sm:$0xff]   ;;  %v1980_v45 = vld [vmem:[#allocation8] ss:$8 sps:$4 sm:$0xff]   ;;  %v1988_v47 = vld [vmem:[#allocation8 + $0xf4] ss:$8 sps:$4 sm:$0xff]  }
  0x7c   :  { %789 = vmatprep.subr.bf16.mxu1 %v1949_v20  ;;  %v1985_v44 = vld [vmem:[#allocation10 + $0x4] ss:$8 sps:$4 sm:$0xff]   ;;  %v1983_v46 = vld [vmem:[#allocation10] ss:$8 sps:$4 sm:$0xff]   ;;  %v1991_v48 = vld [vmem:[#allocation10 + $0xf4] ss:$8 sps:$4 sm:$0xff]  }
  0x7d   :  { %v1986_v49 = vld [vmem:[#allocation8 + $0xf0] ss:$8 sps:$4 sm:$0xff]   ;;  %v1994_v51 = vld [vmem:[#allocation8 + $0xe4] ss:$8 sps:$4 sm:$0xff]   ;;  %v1992_v53 = vld [vmem:[#allocation8 + $0xe0] ss:$8 sps:$4 sm:$0xff]  }
  0x7e   :  { %541 = vmatpush1.bf16.msra.mxu0 %v1944_v21  ;;  %v1989_v50 = vld [vmem:[#allocation10 + $0xf0] ss:$8 sps:$4 sm:$0xff]   ;;  %v1997_v52 = vld [vmem:[#allocation10 + $0xe4] ss:$8 sps:$4 sm:$0xff]   ;;  %v1995_v54 = vld [vmem:[#allocation10 + $0xe0] ss:$8 sps:$4 sm:$0xff]  }
  0x7f   :  { %790 = vmatpush1.bf16.msra.mxu1 %v1947_v22  ;;  %542 = vmatprep.subr.bf16.mxu0 %v1952_v23  ;;  %v2000_v55 = vld [vmem:[#allocation8 + $0xd4] ss:$8 sps:$4 sm:$0xff]   ;;  %v1998_v57 = vld [vmem:[#allocation8 + $0xd0] ss:$8 sps:$4 sm:$0xff]   ;;  %v2006_v59 = vld [vmem:[#allocation8 + $0xc4] ss:$8 sps:$4 sm:$0xff]  }
  0x80   :  { %791 = vmatprep.subr.bf16.mxu1 %v1955_v24  ;;  %v2003_v56 = vld [vmem:[#allocation10 + $0xd4] ss:$8 sps:$4 sm:$0xff]   ;;  %v2001_v58 = vld [vmem:[#allocation10 + $0xd0] ss:$8 sps:$4 sm:$0xff]   ;;  %v2009_v60 = vld [vmem:[#allocation10 + $0xc4] ss:$8 sps:$4 sm:$0xff]  }
  0x81   :  { %v2004_v61 = vld [vmem:[#allocation8 + $0xc0] ss:$8 sps:$4 sm:$0xff]   ;;  %v2012_v63 = vld [vmem:[#allocation8 + $0xb4] ss:$8 sps:$4 sm:$0xff]   ;;  %v2010_v1 = vld [vmem:[#allocation8 + $0xb0] ss:$8 sps:$4 sm:$0xff]  }
  0x82   :  { %543 = vmatpush1.bf16.msra.mxu0 %v1950_v25  ;;  %v2007_v62 = vld [vmem:[#allocation10 + $0xc0] ss:$8 sps:$4 sm:$0xff]   ;;  %v2015_v0 = vld [vmem:[#allocation10 + $0xb4] ss:$8 sps:$4 sm:$0xff]   ;;  %v2013_v2 = vld [vmem:[#allocation10 + $0xb0] ss:$8 sps:$4 sm:$0xff]  }
  0x83   :  { %792 = vmatpush1.bf16.msra.mxu1 %v1953_v26  ;;  %544 = vmatprep.subr.bf16.mxu0 %v1958_v27  ;;  %v2018_v3 = vld [vmem:[#allocation8 + $0xa4] ss:$8 sps:$4 sm:$0xff]   ;;  %v2016_v5 = vld [vmem:[#allocation8 + $0xa0] ss:$8 sps:$4 sm:$0xff]   ;;  %v2024_v7 = vld [vmem:[#allocation8 + $0x94] ss:$8 sps:$4 sm:$0xff]  }
  0x84   :  { %793 = vmatprep.subr.bf16.mxu1 %v1961_v28  ;;  %v2021_v4 = vld [vmem:[#allocation10 + $0xa4] ss:$8 sps:$4 sm:$0xff]   ;;  %v2019_v6 = vld [vmem:[#allocation10 + $0xa0] ss:$8 sps:$4 sm:$0xff]   ;;  %v2027_v8 = vld [vmem:[#allocation10 + $0x94] ss:$8 sps:$4 sm:$0xff]  }
  0x85   :  { %v2022_v9 = vld [vmem:[#allocation8 + $0x90] ss:$8 sps:$4 sm:$0xff]   ;;  %v2030_v11 = vld [vmem:[#allocation8 + $0x84] ss:$8 sps:$4 sm:$0xff]   ;;  %v2028_v13 = vld [vmem:[#allocation8 + $0x80] ss:$8 sps:$4 sm:$0xff]  }
  0x86   :  { %545 = vmatpush1.bf16.msra.mxu0 %v1956_v29  ;;  %v2025_v10 = vld [vmem:[#allocation10 + $0x90] ss:$8 sps:$4 sm:$0xff]   ;;  %v2033_v12 = vld [vmem:[#allocation10 + $0x84] ss:$8 sps:$4 sm:$0xff]   ;;  %v2031_v14 = vld [vmem:[#allocation10 + $0x80] ss:$8 sps:$4 sm:$0xff]  }
  0x87   :  { %794 = vmatpush1.bf16.msra.mxu1 %v1959_v30  ;;  %546 = vmatprep.subr.bf16.mxu0 %v1964_v31  ;;  %v2036_v15 = vld [vmem:[#allocation11 + $0x74] ss:$8 sps:$4 sm:$0xff]   ;;  %v178_v18 = vshrl.u32 %v177_v17, 7  ;;  %v2085_v17 = vld [vmem:[#allocation13 + $0xf0] ss:$8 sps:$4 sm:$0xff]   ;;  %s2342_s11 = scalar_lea.vmem %s1682_s28, 128 }
  0x88   :  { %795 = vmatprep.subr.bf16.mxu1 %v1967_v32  ;;  %v2039_v16 = vld [vmem:[#allocation13 + $0x74] ss:$8 sps:$4 sm:$0xff]   ;;  %p2343_p3 = scmp.ne.s32.totalorder %s1682_s28, %s2342_s11  ;;  %p2348_p5 = scmp.lt.s32.totalorder %s2342_s11, %s2342_s11 }
  0x89   :  { %v2511_v19 = vsub.s32 0, %v178_v18  ;;  %v187_v20 = vsub.s32 2, %v178_v18  ;;  %v175_v21 = vld [vmem:[#allocation7] sm:$0xf]  ;;  %v2513_v22 = vsub.s32 1, %v178_v18  ;;  %v191_v23 = vsub.s32 3, %v178_v18 }
  0x8a   :  { %547 = vmatpush1.bf16.msra.mxu0 %v1962_v33  ;;  %v2090_v18 = vld [vmem:[#allocation11 + $0xe4] ss:$8 sps:$4 sm:$0xff]   ;;  %p2349_p6 = por %p2348_p5, %p2347_p4 }
  0x8b   :  { %796 = vmatpush1.bf16.msra.mxu1 %v1965_v34  ;;  %548 = vmatprep.subr.bf16.mxu0 %v1970_v35  ;;  %v180_v24 = vrot.slane %v175_v21, %v2511_v19  ;;  %v188_v25 = vrot.slane %v175_v21, %v187_v20  ;;  %v184_v26 = vrot.slane %v175_v21, %v2513_v22  ;;  %v2093_v20 = vld [vmem:[#allocation13 + $0xe4] ss:$8 sps:$4 sm:$0xff]  }
  0x8c   :  { %797 = vmatprep.subr.bf16.mxu1 %v1973_v36  ;;  %v192_v27 = vrot.slane %v175_v21, %v191_v23  ;;  %v2088_v21 = vld [vmem:[#allocation11 + $0xe0] ss:$8 sps:$4 sm:$0xff]   ;;  %p2350_p7 = pnand %p2349_p6, %p2343_p3 }
  0x8d   :  { %v2091_v23 = vld [vmem:[#allocation13 + $0xe0] ss:$8 sps:$4 sm:$0xff]  }
  0x8e   :  { %549 = vmatpush1.bf16.msra.mxu0 %v1968_v37 }
  0x8f   :  { %798 = vmatpush1.bf16.msra.mxu1 %v1971_v38  ;;  %550 = vmatprep.subr.bf16.mxu0 %v1976_v39 }
  0x90   :  { %799 = vmatprep.subr.bf16.mxu1 %v1979_v40 }
  0x92   :  { %551 = vmatpush1.bf16.msra.mxu0 %v1974_v41 }
  0x93   :  { %800 = vmatpush1.bf16.msra.mxu1 %v1977_v42  ;;  %552 = vmatprep.subr.bf16.mxu0 %v1982_v43 }
  0x94   :  { %801 = vmatprep.subr.bf16.mxu1 %v1985_v44 }
  0x96   :  { %553 = vmatpush1.bf16.msra.mxu0 %v1980_v45 }
  0x97   :  { %802 = vmatpush1.bf16.msra.mxu1 %v1983_v46  ;;  %554 = vmatprep.subr.bf16.mxu0 %v1988_v47  ;;  %v2034_v46 = vld [vmem:[#allocation11 + $0x70] ss:$8 sps:$4 sm:$0xff]  }
  0x98   :  { %803 = vmatprep.subr.bf16.mxu1 %v1991_v48  ;;  %v2037_v47 = vld [vmem:[#allocation13 + $0x70] ss:$8 sps:$4 sm:$0xff]  }
  0x9a   :  { %555 = vmatpush2.bf16.msra.mxu0 %v1986_v49 }
  0x9b   :  { %804 = vmatpush2.bf16.msra.mxu1 %v1989_v50  ;;  %556 = vmatprep.subr.bf16.mxu0 %v1994_v51  ;;  %v2042_v50 = vld [vmem:[#allocation11 + $0x64] ss:$8 sps:$4 sm:$0xff]  }
  0x9c   :  { %805 = vmatprep.subr.bf16.mxu1 %v1997_v52  ;;  %v2045_v51 = vld [vmem:[#allocation13 + $0x64] ss:$8 sps:$4 sm:$0xff]   ;;  %v2040_v52 = vld [vmem:[#allocation11 + $0x60] ss:$8 sps:$4 sm:$0xff]  }
  0x9e   :  { %557 = vmatpush2.bf16.msra.mxu0 %v1992_v53  ;;  %v2043_v53 = vld [vmem:[#allocation13 + $0x60] ss:$8 sps:$4 sm:$0xff]  }
  0x9f   :  { %806 = vmatpush2.bf16.msra.mxu1 %v1995_v54  ;;  %558 = vmatprep.subr.bf16.mxu0 %v2000_v55  ;;  %v2048_v54 = vld [vmem:[#allocation11 + $0x54] ss:$8 sps:$4 sm:$0xff]  }
  0xa0   :  { %807 = vmatprep.subr.bf16.mxu1 %v2003_v56  ;;  %v2051_v55 = vld [vmem:[#allocation13 + $0x54] ss:$8 sps:$4 sm:$0xff]   ;;  %v2046_v56 = vld [vmem:[#allocation11 + $0x50] ss:$8 sps:$4 sm:$0xff]  }
  0xa2   :  { %559 = vmatpush2.bf16.msra.mxu0 %v1998_v57  ;;  %v2049_v57 = vld [vmem:[#allocation13 + $0x50] ss:$8 sps:$4 sm:$0xff]  }
  0xa3   :  { %808 = vmatpush2.bf16.msra.mxu1 %v2001_v58  ;;  %560 = vmatprep.subr.bf16.mxu0 %v2006_v59  ;;  %v2054_v58 = vld [vmem:[#allocation11 + $0x44] ss:$8 sps:$4 sm:$0xff]  }
  0xa4   :  { %809 = vmatprep.subr.bf16.mxu1 %v2009_v60  ;;  %v2057_v59 = vld [vmem:[#allocation13 + $0x44] ss:$8 sps:$4 sm:$0xff]   ;;  %v2052_v60 = vld [vmem:[#allocation11 + $0x40] ss:$8 sps:$4 sm:$0xff]  }
  0xa6   :  { %561 = vmatpush2.bf16.msra.mxu0 %v2004_v61  ;;  %v2055_v61 = vld [vmem:[#allocation13 + $0x40] ss:$8 sps:$4 sm:$0xff]  }
  0xa7   :  { %810 = vmatpush2.bf16.msra.mxu1 %v2007_v62  ;;  %562 = vmatprep.subr.bf16.mxu0 %v2012_v63  ;;  %v2060_v62 = vld [vmem:[#allocation11 + $0x34] ss:$8 sps:$4 sm:$0xff]  }
  0xa8   :  { %811 = vmatprep.subr.bf16.mxu1 %v2015_v0  ;;  %v2063_v63 = vld [vmem:[#allocation13 + $0x34] ss:$8 sps:$4 sm:$0xff]   ;;  %v2058_v0 = vld [vmem:[#allocation11 + $0x30] ss:$8 sps:$4 sm:$0xff]  }
  0xaa   :  { %563 = vmatpush2.bf16.msra.mxu0 %v2010_v1  ;;  %v2061_v1 = vld [vmem:[#allocation13 + $0x30] ss:$8 sps:$4 sm:$0xff]  }
  0xab   :  { %812 = vmatpush2.bf16.msra.mxu1 %v2013_v2  ;;  %564 = vmatprep.subr.bf16.mxu0 %v2018_v3  ;;  %v2066_v2 = vld [vmem:[#allocation11 + $0x24] ss:$8 sps:$4 sm:$0xff]  }
  0xac   :  { %813 = vmatprep.subr.bf16.mxu1 %v2021_v4  ;;  %v2069_v3 = vld [vmem:[#allocation13 + $0x24] ss:$8 sps:$4 sm:$0xff]   ;;  %v2064_v4 = vld [vmem:[#allocation11 + $0x20] ss:$8 sps:$4 sm:$0xff]  }
  0xae   :  { %565 = vmatpush2.bf16.msra.mxu0 %v2016_v5  ;;  %v2067_v5 = vld [vmem:[#allocation13 + $0x20] ss:$8 sps:$4 sm:$0xff]  }
  0xaf   :  { %814 = vmatpush2.bf16.msra.mxu1 %v2019_v6  ;;  %566 = vmatprep.subr.bf16.mxu0 %v2024_v7  ;;  %v2072_v6 = vld [vmem:[#allocation11 + $0x14] ss:$8 sps:$4 sm:$0xff]  }
  0xb0   :  { %815 = vmatprep.subr.bf16.mxu1 %v2027_v8  ;;  %v2075_v7 = vld [vmem:[#allocation13 + $0x14] ss:$8 sps:$4 sm:$0xff]   ;;  %v2070_v8 = vld [vmem:[#allocation11 + $0x10] ss:$8 sps:$4 sm:$0xff]  }
  0xb2   :  { %567 = vmatpush2.bf16.msra.mxu0 %v2022_v9  ;;  %v2073_v9 = vld [vmem:[#allocation13 + $0x10] ss:$8 sps:$4 sm:$0xff]  }
  0xb3   :  { %816 = vmatpush2.bf16.msra.mxu1 %v2025_v10  ;;  %568 = vmatprep.subr.bf16.mxu0 %v2030_v11  ;;  %v2078_v10 = vld [vmem:[#allocation11 + $0x4] ss:$8 sps:$4 sm:$0xff]  }
  0xb4   :  { %817 = vmatprep.subr.bf16.mxu1 %v2033_v12  ;;  %v2081_v11 = vld [vmem:[#allocation13 + $0x4] ss:$8 sps:$4 sm:$0xff]   ;;  %v2076_v12 = vld [vmem:[#allocation11] ss:$8 sps:$4 sm:$0xff]  }
  0xb6   :  { %569 = vmatpush2.bf16.msra.mxu0 %v2028_v13  ;;  %v2079_v13 = vld [vmem:[#allocation13] ss:$8 sps:$4 sm:$0xff]  }
  0xb7   :  { %818 = vmatpush2.bf16.msra.mxu1 %v2031_v14  ;;  %1036 = vmatprep.subr.bf16.mxu0 %v2036_v15  ;;  %v2084_v14 = vld [vmem:[#allocation11 + $0xf4] ss:$8 sps:$4 sm:$0xff]  }
  0xb8   :  { %1285 = vmatprep.subr.bf16.mxu1 %v2039_v16  ;;  %v2087_v15 = vld [vmem:[#allocation13 + $0xf4] ss:$8 sps:$4 sm:$0xff]   ;;  %v2082_v16 = vld [vmem:[#allocation11 + $0xf0] ss:$8 sps:$4 sm:$0xff]  }
 0x139   :  { %v278_v28 = vpop.f32.mrf.mxu0 }
 0x13a   :  { %v319_v29 = vpop.f32.mrf.mxu1  ;;  %v279_v30 = vadd.f32 %v278_v28, %v180_v24  ;;  %v2096_v24 = vld [vmem:[#allocation11 + $0xd4] ss:$8 sps:$4 sm:$0xff]   ;;  %v2102_v28 = vld [vmem:[#allocation11 + $0xc4] ss:$8 sps:$4 sm:$0xff]  }
 0x13b   :  { %v320_v31 = vadd.f32 %v319_v29, %v188_v25  ;;  %v280_v32 = vpop.f32.mrf.mxu0  ;;  %v2099_v25 = vld [vmem:[#allocation13 + $0xd4] ss:$8 sps:$4 sm:$0xff]   ;;  %v2105_v29 = vld [vmem:[#allocation13 + $0xc4] ss:$8 sps:$4 sm:$0xff]  }
 0x13c   :  { %v321_v33 = vpop.f32.mrf.mxu1  ;;  %v281_v34 = vadd.f32 %v280_v32, %v184_v26  ;;  %v326_v36 = vmax.f32 %v279_v30, 0.0  ;;  %v2094_v26 = vld [vmem:[#allocation11 + $0xd0] ss:$8 sps:$4 sm:$0xff]   ;;  %v2100_v30 = vld [vmem:[#allocation11 + $0xc0] ss:$8 sps:$4 sm:$0xff]  }
 0x13d   :  { %v322_v35 = vadd.f32 %v321_v33, %v192_v27  ;;  %v328_v37 = vmax.f32 %v320_v31, 0.0  ;;  %v282_v38 = vpop.f32.mrf.mxu0  ;;  %v2097_v27 = vld [vmem:[#allocation13 + $0xd0] ss:$8 sps:$4 sm:$0xff]   ;;  %v2103_v31 = vld [vmem:[#allocation13 + $0xc0] ss:$8 sps:$4 sm:$0xff]  }
 0x13e   :  { %v323_v39 = vpop.f32.mrf.mxu1  ;;  %v327_v40 = vmax.f32 %v281_v34, 0.0  ;;  %v330_v48 = vpack.c.bf16 %v326_v36, %v326_v36  ;;  %v2108_v32 = vld [vmem:[#allocation11 + $0xb4] ss:$8 sps:$4 sm:$0xff]   ;;  %v2106_v34 = vld [vmem:[#allocation11 + $0xb0] ss:$8 sps:$4 sm:$0xff]  }
 0x13f   :  { %v329_v41 = vmax.f32 %v322_v35, 0.0  ;;  %v283_v42 = vpop.f32.mrf.mxu0  ;;  %v332_v49 = vpack.c.bf16 %v328_v37, %v328_v37  ;;  %v2111_v33 = vld [vmem:[#allocation13 + $0xb4] ss:$8 sps:$4 sm:$0xff]   ;;  %v2109_v35 = vld [vmem:[#allocation13 + $0xb0] ss:$8 sps:$4 sm:$0xff]  }
 0x140   :  { %v324_v43 = vpop.f32.mrf.mxu1  ;;  %v331_v44 = vpack.c.bf16 %v327_v40, %v327_v40  ;;  %v2114_v36 = vld [vmem:[#allocation11 + $0xa4] ss:$8 sps:$4 sm:$0xff]   ;;  %v2112_v38 = vld [vmem:[#allocation11 + $0xa0] ss:$8 sps:$4 sm:$0xff]   ;;  %v2120_v40 = vld [vmem:[#allocation11 + $0x94] ss:$8 sps:$4 sm:$0xff]  }
 0x141   :  { %v333_v45 = vpack.c.bf16 %v329_v41, %v329_v41  ;;  %v2117_v37 = vld [vmem:[#allocation13 + $0xa4] ss:$8 sps:$4 sm:$0xff]   ;;  %v2115_v39 = vld [vmem:[#allocation13 + $0xa0] ss:$8 sps:$4 sm:$0xff]   ;;  %v2123_v41 = vld [vmem:[#allocation13 + $0x94] ss:$8 sps:$4 sm:$0xff]  }
 0x142   :  { %570 = vmatprep.mubr.bf16.mxu0 %v331_v44  ;;  %v2118_v42 = vld [vmem:[#allocation11 + $0x90] ss:$8 sps:$4 sm:$0xff]   ;;  %v2126_v44 = vld [vmem:[#allocation11 + $0x84] ss:$8 sps:$4 sm:$0xff]  }
 0x143   :  { %819 = vmatprep.mubr.bf16.mxu1 %v333_v45  ;;  %571 = vmatmul.mubr.bf16.vlgmr.msra.gmra.mxu0 %v330_v48  ;;  %v2121_v43 = vld [vmem:[#allocation13 + $0x90] ss:$8 sps:$4 sm:$0xff]   ;;  %v2129_v45 = vld [vmem:[#allocation13 + $0x84] ss:$8 sps:$4 sm:$0xff]  }
 0x144   :  { %820 = vmatmul.mubr.bf16.vlgmr.msra.gmra.mxu1 %v332_v49  ;;  %1037 = vmatpush1.bf16.msra.mxu0 %v2034_v46  ;;  %v2124_v46 = vld [vmem:[#allocation11 + $0x80] ss:$8 sps:$4 sm:$0xff]   ;;  %v2130_v48 = vld [vmem:[#allocation16 + $0x78] sm:$0xff]  }
 0x145   :  { %1286 = vmatpush1.bf16.msra.mxu1 %v2037_v47  ;;  %1038 = vmatprep.subr.bf16.mxu0 %v2042_v50  ;;  %v2127_v47 = vld [vmem:[#allocation13 + $0x80] ss:$8 sps:$4 sm:$0xff]   ;;  %v2131_v49 = vld [vmem:[#allocation14 + $0x78] sm:$0xff]   ;;  %v366_v50 = vld [vmem:[%s2547_s4] sm:$0x3] }
 0x146   :  { %1287 = vmatprep.subr.bf16.mxu1 %v2045_v51  ;;  %v615_v51 = vld [vmem:[%s2549_s6] sm:$0x3] }
 0x148   :  { %1039 = vmatpush1.bf16.msra.mxu0 %v2040_v52  ;;  %v371_v52 = vrot.slane %v366_v50, %v2511_v19 }
 0x149   :  { %1288 = vmatpush1.bf16.msra.mxu1 %v2043_v53  ;;  %1040 = vmatprep.subr.bf16.mxu0 %v2048_v54  ;;  %v620_v53 = vrot.slane %v615_v51, %v2511_v19  ;;  %v375_v54 = vrot.slane %v366_v50, %v2513_v22 }
 0x14a   :  { %1289 = vmatprep.subr.bf16.mxu1 %v2051_v55  ;;  %v624_v55 = vrot.slane %v615_v51, %v2513_v22 }
 0x14c   :  { %1041 = vmatpush1.bf16.msra.mxu0 %v2046_v56 }
 0x14d   :  { %1290 = vmatpush1.bf16.msra.mxu1 %v2049_v57  ;;  %1042 = vmatprep.subr.bf16.mxu0 %v2054_v58 }
 0x14e   :  { %1291 = vmatprep.subr.bf16.mxu1 %v2057_v59 }
 0x150   :  { %1043 = vmatpush1.bf16.msra.mxu0 %v2052_v60 }
 0x151   :  { %1292 = vmatpush1.bf16.msra.mxu1 %v2055_v61  ;;  %1044 = vmatprep.subr.bf16.mxu0 %v2060_v62 }
 0x152   :  { %1293 = vmatprep.subr.bf16.mxu1 %v2063_v63 }
 0x154   :  { %1045 = vmatpush1.bf16.msra.mxu0 %v2058_v0 }
 0x155   :  { %1294 = vmatpush1.bf16.msra.mxu1 %v2061_v1  ;;  %1046 = vmatprep.subr.bf16.mxu0 %v2066_v2 }
 0x156   :  { %1295 = vmatprep.subr.bf16.mxu1 %v2069_v3 }
 0x158   :  { %1047 = vmatpush1.bf16.msra.mxu0 %v2064_v4 }
 0x159   :  { %1296 = vmatpush1.bf16.msra.mxu1 %v2067_v5  ;;  %1048 = vmatprep.subr.bf16.mxu0 %v2072_v6 }
 0x15a   :  { %1297 = vmatprep.subr.bf16.mxu1 %v2075_v7 }
 0x15c   :  { %1049 = vmatpush1.bf16.msra.mxu0 %v2070_v8 }
 0x15d   :  { %1298 = vmatpush1.bf16.msra.mxu1 %v2073_v9  ;;  %1050 = vmatprep.subr.bf16.mxu0 %v2078_v10  ;;  %v2132_v10 = vld [vmem:[#allocation16 + $0x38] sm:$0xff]  }
 0x15e   :  { %1299 = vmatprep.subr.bf16.mxu1 %v2081_v11  ;;  %v2133_v11 = vld [vmem:[#allocation14 + $0x38] sm:$0xff]  }
 0x160   :  { %1051 = vmatpush1.bf16.msra.mxu0 %v2076_v12 }
 0x161   :  { %1300 = vmatpush1.bf16.msra.mxu1 %v2079_v13  ;;  %1052 = vmatprep.subr.bf16.mxu0 %v2084_v14  ;;  %v2134_v14 = vld [vmem:[#allocation16 + $0x70] sm:$0xff]  }
 0x162   :  { %1301 = vmatprep.subr.bf16.mxu1 %v2087_v15  ;;  %v2135_v15 = vld [vmem:[#allocation14 + $0x70] sm:$0xff]  }
 0x164   :  { %1053 = vmatpush2.bf16.msra.mxu0 %v2082_v16  ;;  %v2136_v16 = vld [vmem:[#allocation16 + $0x30] sm:$0xff]  }
 0x165   :  { %1302 = vmatpush2.bf16.msra.mxu1 %v2085_v17  ;;  %1054 = vmatprep.subr.bf16.mxu0 %v2090_v18  ;;  %v2137_v17 = vld [vmem:[#allocation14 + $0x30] sm:$0xff]   ;;  %v2138_v18 = vld [vmem:[#allocation16 + $0x68] sm:$0xff]  }
 0x166   :  { %1303 = vmatprep.subr.bf16.mxu1 %v2093_v20  ;;  %v2139_v20 = vld [vmem:[#allocation14 + $0x68] sm:$0xff]  }
 0x168   :  { %1055 = vmatpush2.bf16.msra.mxu0 %v2088_v21  ;;  %v2140_v21 = vld [vmem:[#allocation16 + $0x28] sm:$0xff]  }
 0x169   :  { %1304 = vmatpush2.bf16.msra.mxu1 %v2091_v23  ;;  %1056 = vmatprep.subr.bf16.mxu0 %v2096_v24  ;;  %v2141_v23 = vld [vmem:[#allocation14 + $0x28] sm:$0xff]   ;;  %v2142_v24 = vld [vmem:[#allocation16 + $0x60] sm:$0xff]  }
 0x16a   :  { %1305 = vmatprep.subr.bf16.mxu1 %v2099_v25  ;;  %v2143_v25 = vld [vmem:[#allocation14 + $0x60] sm:$0xff]  }
 0x16c   :  { %1057 = vmatpush2.bf16.msra.mxu0 %v2094_v26  ;;  %v2144_v26 = vld [vmem:[#allocation16 + $0x20] sm:$0xff]  }
 0x16d   :  { %1306 = vmatpush2.bf16.msra.mxu1 %v2097_v27  ;;  %1058 = vmatprep.subr.bf16.mxu0 %v2102_v28  ;;  %v2145_v27 = vld [vmem:[#allocation14 + $0x20] sm:$0xff]   ;;  %v2146_v28 = vld [vmem:[#allocation16 + $0x58] sm:$0xff]  }
 0x16e   :  { %1307 = vmatprep.subr.bf16.mxu1 %v2105_v29  ;;  %v2147_v29 = vld [vmem:[#allocation14 + $0x58] sm:$0xff]  }
 0x170   :  { %1059 = vmatpush2.bf16.msra.mxu0 %v2100_v30  ;;  %v2148_v30 = vld [vmem:[#allocation16 + $0x18] sm:$0xff]  }
 0x171   :  { %1308 = vmatpush2.bf16.msra.mxu1 %v2103_v31  ;;  %1060 = vmatprep.subr.bf16.mxu0 %v2108_v32  ;;  %v2149_v31 = vld [vmem:[#allocation14 + $0x18] sm:$0xff]   ;;  %v2150_v32 = vld [vmem:[#allocation16 + $0x50] sm:$0xff]  }
 0x172   :  { %1309 = vmatprep.subr.bf16.mxu1 %v2111_v33  ;;  %v2151_v33 = vld [vmem:[#allocation14 + $0x50] sm:$0xff]  }
 0x174   :  { %1061 = vmatpush2.bf16.msra.mxu0 %v2106_v34  ;;  %v2152_v34 = vld [vmem:[#allocation16 + $0x10] sm:$0xff]  }
 0x175   :  { %1310 = vmatpush2.bf16.msra.mxu1 %v2109_v35  ;;  %1062 = vmatprep.subr.bf16.mxu0 %v2114_v36  ;;  %v2153_v35 = vld [vmem:[#allocation14 + $0x10] sm:$0xff]   ;;  %v2154_v36 = vld [vmem:[#allocation16 + $0x48] sm:$0xff]  }
 0x176   :  { %1311 = vmatprep.subr.bf16.mxu1 %v2117_v37  ;;  %v2155_v37 = vld [vmem:[#allocation14 + $0x48] sm:$0xff]  }
 0x178   :  { %1063 = vmatpush2.bf16.msra.mxu0 %v2112_v38  ;;  %v2156_v38 = vld [vmem:[#allocation16 + $0x8] sm:$0xff]  }
 0x179   :  { %1312 = vmatpush2.bf16.msra.mxu1 %v2115_v39  ;;  %1064 = vmatprep.subr.bf16.mxu0 %v2120_v40  ;;  %v2157_v39 = vld [vmem:[#allocation14 + $0x8] sm:$0xff]   ;;  %v2158_v40 = vld [vmem:[#allocation16 + $0x40] sm:$0xff]  }
 0x17a   :  { %1313 = vmatprep.subr.bf16.mxu1 %v2123_v41  ;;  %v2159_v41 = vld [vmem:[#allocation14 + $0x40] sm:$0xff]  }
 0x17c   :  { %1065 = vmatpush2.bf16.msra.mxu0 %v2118_v42  ;;  %v2160_v42 = vld [vmem:[#allocation16] sm:$0xff]  }
 0x17d   :  { %1314 = vmatpush2.bf16.msra.mxu1 %v2121_v43  ;;  %1066 = vmatprep.subr.bf16.mxu0 %v2126_v44  ;;  %v2161_v43 = vld [vmem:[#allocation14] sm:$0xff]  }
 0x17e   :  { %1315 = vmatprep.subr.bf16.mxu1 %v2129_v45  ;;  %v864_v44 = vld [vmem:[%s2551_s8] sm:$0x3] }
 0x17f   :  { %v1113_v45 = vld [vmem:[%s2553_s10] sm:$0x3] }
 0x180   :  { %1067 = vmatpush2.bf16.msra.mxu0 %v2124_v46  ;;  %v869_v46 = vrot.slane %v864_v44, %v2511_v19 }
 0x181   :  { %1316 = vmatpush2.bf16.msra.mxu1 %v2127_v47  ;;  %1867 = vmatprep.subr.bf16.mxu0 %v2130_v48  ;;  %v1118_v47 = vrot.slane %v1113_v45, %v2511_v19  ;;  %v873_v48 = vrot.slane %v864_v44, %v2513_v22 }
 0x182   :  { %1889 = vmatprep.subr.bf16.mxu1 %v2131_v49  ;;  %v1122_v49 = vrot.slane %v1113_v45, %v2513_v22 }
 0x203   :  { %v572_v56 = vpop.f32.mrf.mxu0 }
 0x204   :  { %v821_v57 = vpop.f32.mrf.mxu1  ;;  %v573_v58 = vadd.f32 %v572_v56, %v371_v52 }
 0x205   :  { %v822_v59 = vadd.f32 %v821_v57, %v620_v53  ;;  %v574_v60 = vpop.f32.mrf.mxu0 }
 0x206   :  { %v823_v61 = vpop.f32.mrf.mxu1  ;;  %v575_v62 = vadd.f32 %v574_v60, %v375_v54  ;;  %v579_v0 = vmax.f32 %v573_v58, 0.0 }
 0x207   :  { %v824_v63 = vadd.f32 %v823_v61, %v624_v55  ;;  %v828_v1 = vmax.f32 %v822_v59, 0.0  ;;  %v576_v2 = vpop.f32.mrf.mxu0 }
 0x208   :  { %v825_v3 = vpop.f32.mrf.mxu1  ;;  %v580_v4 = vmax.f32 %v575_v62, 0.0  ;;  %v581_v12 = vpack.c.bf16 %v579_v0, %v579_v0 }
 0x209   :  { %v829_v5 = vmax.f32 %v824_v63, 0.0  ;;  %v577_v6 = vpop.f32.mrf.mxu0  ;;  %v830_v13 = vpack.c.bf16 %v828_v1, %v828_v1 }
 0x20a   :  { %v826_v7 = vpop.f32.mrf.mxu1  ;;  %v582_v8 = vpack.c.bf16 %v580_v4, %v580_v4 }
 0x20b   :  { %v831_v9 = vpack.c.bf16 %v829_v5, %v829_v5 }
 0x20c   :  { %1068 = vmatprep.mubr.bf16.mxu0 %v582_v8 }
 0x20d   :  { %1317 = vmatprep.mubr.bf16.mxu1 %v831_v9  ;;  %1069 = vmatmul.mubr.bf16.vlgmr.msra.gmra.mxu0 %v581_v12  ;;  %v1866_v12 = vld [vmem:[%s2556_s13] ss:$0 sm:$0xff] }
 0x20e   :  { %1318 = vmatmul.mubr.bf16.vlgmr.msra.gmra.mxu1 %v830_v13  ;;  %1868 = vmatpush3.bf16.msra.mxu0 %v2132_v10 }
 0x20f   :  { %1890 = vmatpush3.bf16.msra.mxu1 %v2133_v11  ;;  %1869 = vmatprep.subr.bf16.mxu0 %v2134_v14 }
 0x210   :  { %1891 = vmatprep.subr.bf16.mxu1 %v2135_v15 }
 0x212   :  { %1870 = vmatpush3.bf16.msra.mxu0 %v2136_v16 }
 0x213   :  { %1892 = vmatpush3.bf16.msra.mxu1 %v2137_v17  ;;  %1871 = vmatprep.subr.bf16.mxu0 %v2138_v18 }
 0x214   :  { %1893 = vmatprep.subr.bf16.mxu1 %v2139_v20 }
 0x216   :  { %1872 = vmatpush3.bf16.msra.mxu0 %v2140_v21 }
 0x217   :  { %1894 = vmatpush3.bf16.msra.mxu1 %v2141_v23  ;;  %1873 = vmatprep.subr.bf16.mxu0 %v2142_v24 }
 0x218   :  { %1895 = vmatprep.subr.bf16.mxu1 %v2143_v25 }
 0x21a   :  { %1874 = vmatpush3.bf16.msra.mxu0 %v2144_v26 }
 0x21b   :  { %1896 = vmatpush3.bf16.msra.mxu1 %v2145_v27  ;;  %1875 = vmatprep.subr.bf16.mxu0 %v2146_v28 }
 0x21c   :  { %1897 = vmatprep.subr.bf16.mxu1 %v2147_v29 }
 0x21e   :  { %1876 = vmatpush3.bf16.msra.mxu0 %v2148_v30 }
 0x21f   :  { %1898 = vmatpush3.bf16.msra.mxu1 %v2149_v31  ;;  %1877 = vmatprep.subr.bf16.mxu0 %v2150_v32 }
 0x220   :  { %1899 = vmatprep.subr.bf16.mxu1 %v2151_v33 }
 0x222   :  { %1878 = vmatpush3.bf16.msra.mxu0 %v2152_v34 }
 0x223   :  { %1900 = vmatpush3.bf16.msra.mxu1 %v2153_v35  ;;  %1879 = vmatprep.subr.bf16.mxu0 %v2154_v36 }
 0x224   :  { %1901 = vmatprep.subr.bf16.mxu1 %v2155_v37 }
 0x226   :  { %1880 = vmatpush3.bf16.msra.mxu0 %v2156_v38 }
 0x227   :  { %1902 = vmatpush3.bf16.msra.mxu1 %v2157_v39  ;;  %1881 = vmatprep.subr.bf16.mxu0 %v2158_v40 }
 0x228   :  { %1903 = vmatprep.subr.bf16.mxu1 %v2159_v41 }
 0x22a   :  { %1882 = vmatpush3.bf16.msra.mxu0 %v2160_v42 }
 0x22b   :  { %1904 = vmatpush3.bf16.msra.mxu1 %v2161_v43 }
 0x2cd   :  { %v1070_v50 = vpop.f32.mrf.mxu0 }
 0x2ce   :  { %v1319_v51 = vpop.f32.mrf.mxu1  ;;  %v1071_v52 = vadd.f32 %v1070_v50, %v869_v46 }
 0x2cf   :  { %v1320_v53 = vadd.f32 %v1319_v51, %v1118_v47  ;;  %v1072_v54 = vpop.f32.mrf.mxu0 }
 0x2d0   :  { %v1321_v55 = vpop.f32.mrf.mxu1  ;;  %v1073_v56 = vadd.f32 %v1072_v54, %v873_v48  ;;  %v1077_v58 = vmax.f32 %v1071_v52, 0.0 }
 0x2d1   :  { %v1322_v57 = vadd.f32 %v1321_v55, %v1122_v49  ;;  %v1326_v59 = vmax.f32 %v1320_v53, 0.0  ;;  %v1074_v60 = vpop.f32.mrf.mxu0 }
 0x2d2   :  { %v1323_v61 = vpop.f32.mrf.mxu1  ;;  %v1078_v62 = vmax.f32 %v1073_v56, 0.0  ;;  %v1079_v3 = vpack.c.bf16 %v1077_v58, %v1077_v58 }
 0x2d3   :  { %v1327_v63 = vmax.f32 %v1322_v57, 0.0  ;;  %v1075_v0 = vpop.f32.mrf.mxu0  ;;  %v1328_v22 = vpack.c.bf16 %v1326_v59, %v1326_v59 }
 0x2d4   :  { %v1324_v19 = vpop.f32.mrf.mxu1  ;;  %v1080_v1 = vpack.c.bf16 %v1078_v62, %v1078_v62 }
 0x2d5   :  { %v1329_v2 = vpack.c.bf16 %v1327_v63, %v1327_v63 }
 0x2d6   :  { %1658 = vmatprep.mubr.bf16.mxu1 %v1080_v1 }
 0x2d7   :  { %1522 = vmatprep.mubr.bf16.mxu0 %v1329_v2  ;;  %1659 = vmatmul.mubr.bf16.vlgmr.msra.gmra.mxu1 %v1079_v3 }
 0x2d8   :  { %1523 = vmatmul.mubr.bf16.vlgmr.msra.gmra.mxu0 %v1328_v22 }
 0x397   :  { %v1905_v5 = vpop.f32.mrf.mxu1 }
 0x398   :  { %v1883_v4 = vpop.f32.mrf.mxu0 }
 0x399   :  { %v1906_v7 = vpop.f32.mrf.mxu1 }
 0x39a   :  { %v1884_v6 = vpop.f32.mrf.mxu0  ;;  %v1907_v9 = vadd.f32 %v1906_v7, %v1905_v5 }
 0x39b   :  { %v1885_v8 = vadd.f32 %v1884_v6, %v1883_v4  ;;  %v1908_v11 = vpop.f32.mrf.mxu1 }
 0x39c   :  { %v1886_v10 = vpop.f32.mrf.mxu0 }
 0x39d   :  { %v1661_v13 = vadd.f32 %v1907_v9, %v1885_v8  ;;  %v1909_v15 = vpop.f32.mrf.mxu1 }
 0x39e   :  { %v1887_v14 = vpop.f32.mrf.mxu0 }
 0x39f   :  { %v1673_v16 = vadd.f32 %v1866_v12, %v1661_v13 }
 0x3a1   :  { %1674 = vst [vmem:[#allocation17] sm:$0xff] %v1673_v16 }
 0x3a2   :  { %2353 = shalt.err (!%p2350_p7)
}
 0x3a3   :  { %1684 = dma.vmem_to_hbm [thread:$0]  %s1682_s28, 128, %s2557_s14, [#allocation4]  }
 0x3a4   :  { %2372 = dma.done.wait [#allocation4], 128  }
 0x3a5   :  { %2373 = vsyncadd [#allocation4], 4294967168 }
 0x3a6   :  { %1688 = vsyncpa [#allocation3], 1 }
 0x3a7   :  { %1689 = vsyncpa [#allocation6], 1 }
 0x3a8   :  { %1690 = vsyncpa [#allocation9], 1 }
 0x3a9   :  { %1691 = vsyncpa [#allocation12], 1 }
 0x3aa   :  { %1692 = vsyncpa [#allocation15], 1 }
 0x3ab   :  { %1693 = vsyncpa [#allocation4], 1 }

</bundles_post_ra>
